<compile_context>
chip_gen: v7x
topology: tpu7x:2x2x1
jax: 0.10.0
libtpu: 0.0.40
codegen_flags: <defaults>
</compile_context>

<pallas_src>
import jax
import jax.numpy as jnp
from jax.experimental import pallas as pl
from jax.experimental.pallas import tpu as pltpu


def output_head_kernel(x_ref, m_ref, wc_ref, bc_ref, wl_ref, bl_ref, o_ref):
    # x_ref : (TB, C*HW)  features, native dtype (VMEM)
    # m_ref : (TB, HW)    spatial mask, native dtype (VMEM)
    # wc_ref: (C,)        1x1-conv weight, f32 (SMEM scalars)
    # bc_ref: (1,)        1x1-conv bias, f32 (SMEM scalar)
    # wl_ref: (1, NBP)    classifier weight, zero-padded to NBP (VMEM f32)
    # bl_ref: (1, NBP)    classifier bias, zero-padded to NBP (VMEM f32)
    # o_ref : (TB, NBP)   logits slab for this batch tile (VMEM f32)
    hw = m_ref.shape[-1]
    c_channels = x_ref.shape[-1] // hw

    # Cast on load, accumulate in f32 (required on v5e, cheap everywhere).
    m = m_ref[...].astype(jnp.float32)                              # (TB, HW)
    acc = bc_ref[0] * jnp.sum(m, axis=-1, keepdims=True)            # bc * sum(mask)

    # Fused masked pool, one channel chunk at a time: VPU multiply + XLU lane
    # reduce, weighted by an SMEM scalar.  Keeps f32 temporaries ~chunk-sized.
    # TODO(synk): for very large channel counts switch this static unroll to a
    # lax.fori_loop over pl.ds chunks (code-size only; C at the head is small).
    for c in range(c_channels):
        xc = x_ref[:, c * hw:(c + 1) * hw].astype(jnp.float32)      # (TB, HW)
        acc = acc + wc_ref[c] * jnp.sum(xc * m, axis=-1, keepdims=True)

    # conv + masked mean over all HW pixels (AdaptiveAvgPool2d semantics).
    pooled = acc * (1.0 / hw)                                       # (TB, 1)

    # Linear(1, num_bins): scalar-per-row * weight row + bias (lane-dense store).
    o_ref[...] = pooled * wl_ref[...] + bl_ref[...]                 # (TB, NBP)


def _vmem_budget_bytes():
    """Returns (working-set byte budget, scoped vmem limit) per TPU generation."""
    try:
        cap = int(getattr(pltpu.get_tpu_info(), "vmem_capacity_bytes", 0))
    except Exception:
        cap = 0
    if cap >= 96 * 1024 * 1024:
        # v5e / v6e: 128 MiB physical VMEM.
        return 48 * 1024 * 1024, 64 * 1024 * 1024
    # v7x (64 MiB physical) or unknown: conservative.
    return 24 * 1024 * 1024, 40 * 1024 * 1024


def _pick_batch_tile(B, per_tb_bytes, budget_bytes):
    """Largest batch tile that fits the byte budget; multiple of 8 (sublane
    constraint for 2D blocks) unless it covers the whole batch."""
    tb = budget_bytes // max(per_tb_bytes, 1)
    if tb >= B:
        return B
    tb = (tb // 8) * 8
    if tb < 8:
        # Per-sample footprint exceeds the budget; fall back to the minimum
        # legal tile (see TODO at top about a CHW reduction axis).
        tb = 8
    # Rebalance so grid steps are as even as possible (still a multiple of 8).
    g = -(-B // tb)
    tb = min(tb, ((-(-B // g) + 7) // 8) * 8)
    return min(tb, B)


def output_head(x, mask, w_conv, b_conv, w_cls, b_cls):
    """x: (B, C, H, W), mask: (B, 1, H, W). Returns logits (B, num_bins) in f32.

    x and mask are streamed in their stored dtype (no wrapper up-cast)."""
    B, C, H, W = x.shape
    HW = H * W
    CHW = C * HW

    # Normalize parameter layouts: Conv2d(C,1,1).weight may be (1,C,1,1)/(1,C)/(C,),
    # Linear(1,NB).weight may be (NB,1) or (1,NB) — each has one non-unit axis.
    wc = jnp.asarray(w_conv, jnp.float32).reshape(-1)
    assert wc.shape[0] == C, (wc.shape, C)
    bc = jnp.asarray(b_conv, jnp.float32).reshape(-1)[:1]
    wl_flat = jnp.asarray(w_cls, jnp.float32).reshape(-1)
    bl_flat = jnp.asarray(b_cls, jnp.float32).reshape(-1)
    num_bins = wl_flat.shape[0]
    assert bl_flat.shape[0] == num_bins, (bl_flat.shape, num_bins)
    NBP = ((num_bins + 127) // 128) * 128       # lane-dense padded bin count

    wl = jnp.zeros((1, NBP), jnp.float32).at[0, :num_bins].set(wl_flat)
    bl = jnp.zeros((1, NBP), jnp.float32).at[0, :num_bins].set(bl_flat)

    # Lane-dense streaming layouts; reshapes only (no dtype pass over HBM).
    xr = x.reshape(B, CHW)
    mr = mask.reshape(B, HW)

    # Per-batch-row VMEM footprint: double-buffered inputs + ~one f32 copy of
    # the x block worth of in-kernel temporaries + a few HW-sized f32 temps.
    isx = jnp.dtype(x.dtype).itemsize
    ism = jnp.dtype(mask.dtype).itemsize
    per_tb = CHW * (2 * isx + 4) + HW * (2 * ism + 12)
    budget, vmem_limit = _vmem_budget_bytes()
    TB = _pick_batch_tile(B, per_tb, budget)
    G = -(-B // TB)   # cdiv; trailing partial block rows are masked on write

    out = pl.pallas_call(
        output_head_kernel,
        out_shape=jax.ShapeDtypeStruct((B, NBP), jnp.float32),
        grid_spec=pltpu.PrefetchScalarGridSpec(
            num_scalar_prefetch=0,
            grid=(G,),
            in_specs=[
                pl.BlockSpec((TB, CHW), lambda b: (b, 0)),            # x rows
                pl.BlockSpec((TB, HW), lambda b: (b, 0)),             # mask rows
                pl.BlockSpec(memory_space=pltpu.MemorySpace.SMEM),    # conv weight
                pl.BlockSpec(memory_space=pltpu.MemorySpace.SMEM),    # conv bias
                pl.BlockSpec((1, NBP), lambda b: (0, 0)),             # cls weight
                pl.BlockSpec((1, NBP), lambda b: (0, 0)),             # cls bias
            ],
            out_specs=pl.BlockSpec((TB, NBP), lambda b: (b, 0)),
        ),
        compiler_params=pltpu.CompilerParams(
            dimension_semantics=("parallel",),
            vmem_limit_bytes=vmem_limit,
        ),
    )(xr, mr, wc, bc, wl, bl)

    return out[:, :num_bins]


def reference(x, mask, w_conv, b_conv, w_cls, b_cls):
    # Pure-JAX reference mirroring the PyTorch module (NCHW).
    xf = x.astype(jnp.float32)
    mf = mask.astype(jnp.float32)
    feat = jnp.einsum("bchw,oc->bohw", xf, w_conv.astype(jnp.float32)) \
        + b_conv.astype(jnp.float32)                                  # (B,1,H,W)
    pooled = jnp.mean(feat * mf, axis=(2, 3))                         # (B,1)
    return pooled @ w_cls.reshape(1, -1).astype(jnp.float32) \
        + b_cls.reshape(1, -1).astype(jnp.float32)                    # (B,NB)


if __name__ == "__main__":
    B, C, H, W = 2, 4, 16, 16
    num_bins = 10

    key = jax.random.PRNGKey(0)
    kx, km, kw, kb, kcw, kcb = jax.random.split(key, 6)

    x = jax.random.normal(kx, (B, C, H, W), dtype=jnp.float32)
    mask = (jax.random.uniform(km, (B, 1, H, W)) > 0.5).astype(jnp.float32)

    # Synthetic parameters (shapes per nn.Conv2d(C,1,1) / nn.Linear(1,num_bins)).
    w_conv = jax.random.normal(kw, (1, C), dtype=jnp.float32) * 0.1    # Conv2d weight (1,C,1,1) squeezed
    b_conv = jax.random.normal(kb, (1,), dtype=jnp.float32) * 0.1      # Conv2d bias
    w_cls = jax.random.normal(kcw, (1, num_bins), dtype=jnp.float32)   # Linear weight.T
    b_cls = jax.random.normal(kcb, (num_bins,), dtype=jnp.float32)     # Linear bias

    logits = output_head(x, mask, w_conv, b_conv, w_cls, b_cls)
    logits = jax.block_until_ready(logits)

    ref = reference(x, mask, w_conv, b_conv, w_cls, b_cls)
    assert logits.shape == (B, num_bins), logits.shape
    assert jnp.allclose(logits, ref, atol=1e-5, rtol=1e-5), (logits, ref)

    print("KERNEL_OK")
</pallas_src>

<mosaic_0001>
module attributes {stable_mosaic.version = 11 : i64} {
  func.func @output_head_kernel(%arg0: i32, %arg1: memref<2x1024xf32, #tpu.memory_space<vmem>>, %arg2: memref<2x256xf32, #tpu.memory_space<vmem>>, %arg3: memref<4xf32, #tpu.memory_space<smem>>, %arg4: memref<1xf32, #tpu.memory_space<smem>>, %arg5: memref<1x128xf32, #tpu.memory_space<vmem>>, %arg6: memref<1x128xf32, #tpu.memory_space<vmem>>, %arg7: memref<2x128xf32, #tpu.memory_space<vmem>>) attributes {dimension_semantics = [#tpu.dimension_semantics<parallel>], iteration_bounds = array<i64: 1>, scalar_prefetch = 0 : i64, scratch_operands = 0 : i64, tpu.core_type = #tpu.core_type<tc>, window_params = [{transform_indices = @transform_0, window_bounds = array<i64: 2, 1024>}, {transform_indices = @transform_1, window_bounds = array<i64: 2, 256>}, {transform_indices = @transform_2, window_bounds = array<i64: 4>}, {transform_indices = @transform_3, window_bounds = array<i64: 1>}, {pipeline_mode = #tpu.pipeline_mode<synchronous>, transform_indices = @transform_4, window_bounds = array<i64: 1, 128>}, {pipeline_mode = #tpu.pipeline_mode<synchronous>, transform_indices = @transform_5, window_bounds = array<i64: 1, 128>}, {transform_indices = @transform_6, window_bounds = array<i64: 2, 128>}]} {
    %c0 = arith.constant 0 : index
    %c0_0 = arith.constant 0 : index
    %0 = vector.load %arg2[%c0, %c0_0] : memref<2x256xf32, #tpu.memory_space<vmem>>, vector<2x256xf32>
    %c0_1 = arith.constant 0 : index
    %1 = memref.load %arg4[%c0_1] : memref<1xf32, #tpu.memory_space<smem>>
    %cst = arith.constant dense<0.000000e+00> : vector<2xf32>
    %2 = vector.multi_reduction <add>, %0, %cst [1] : vector<2x256xf32> to vector<2xf32>
    %3 = vector.shape_cast %2 : vector<2xf32> to vector<2x1xf32>
    %4 = vector.broadcast %1 : f32 to vector<2x1xf32>
    %5 = arith.mulf %4, %3 : vector<2x1xf32>
    %c0_2 = arith.constant 0 : index
    %c0_3 = arith.constant 0 : index
    %6 = vector.load %arg1[%c0_2, %c0_3] : memref<2x1024xf32, #tpu.memory_space<vmem>>, vector<2x256xf32>
    %c0_4 = arith.constant 0 : index
    %7 = memref.load %arg3[%c0_4] : memref<4xf32, #tpu.memory_space<smem>>
    %8 = arith.mulf %6, %0 : vector<2x256xf32>
    %cst_5 = arith.constant dense<0.000000e+00> : vector<2xf32>
    %9 = vector.multi_reduction <add>, %8, %cst_5 [1] : vector<2x256xf32> to vector<2xf32>
    %10 = vector.shape_cast %9 : vector<2xf32> to vector<2x1xf32>
    %11 = vector.broadcast %7 : f32 to vector<2x1xf32>
    %12 = arith.mulf %11, %10 : vector<2x1xf32>
    %13 = arith.addf %5, %12 : vector<2x1xf32>
    %c0_6 = arith.constant 0 : index
    %c256 = arith.constant 256 : index
    %14 = vector.load %arg1[%c0_6, %c256] : memref<2x1024xf32, #tpu.memory_space<vmem>>, vector<2x256xf32>
    %c1 = arith.constant 1 : index
    %15 = memref.load %arg3[%c1] : memref<4xf32, #tpu.memory_space<smem>>
    %16 = arith.mulf %14, %0 : vector<2x256xf32>
    %cst_7 = arith.constant dense<0.000000e+00> : vector<2xf32>
    %17 = vector.multi_reduction <add>, %16, %cst_7 [1] : vector<2x256xf32> to vector<2xf32>
    %18 = vector.shape_cast %17 : vector<2xf32> to vector<2x1xf32>
    %19 = vector.broadcast %15 : f32 to vector<2x1xf32>
    %20 = arith.mulf %19, %18 : vector<2x1xf32>
    %21 = arith.addf %13, %20 : vector<2x1xf32>
    %c0_8 = arith.constant 0 : index
    %c512 = arith.constant 512 : index
    %22 = vector.load %arg1[%c0_8, %c512] : memref<2x1024xf32, #tpu.memory_space<vmem>>, vector<2x256xf32>
    %c2 = arith.constant 2 : index
    %23 = memref.load %arg3[%c2] : memref<4xf32, #tpu.memory_space<smem>>
    %24 = arith.mulf %22, %0 : vector<2x256xf32>
    %cst_9 = arith.constant dense<0.000000e+00> : vector<2xf32>
    %25 = vector.multi_reduction <add>, %24, %cst_9 [1] : vector<2x256xf32> to vector<2xf32>
    %26 = vector.shape_cast %25 : vector<2xf32> to vector<2x1xf32>
    %27 = vector.broadcast %23 : f32 to vector<2x1xf32>
    %28 = arith.mulf %27, %26 : vector<2x1xf32>
    %29 = arith.addf %21, %28 : vector<2x1xf32>
    %c0_10 = arith.constant 0 : index
    %c768 = arith.constant 768 : index
    %30 = vector.load %arg1[%c0_10, %c768] : memref<2x1024xf32, #tpu.memory_space<vmem>>, vector<2x256xf32>
    %c3 = arith.constant 3 : index
    %31 = memref.load %arg3[%c3] : memref<4xf32, #tpu.memory_space<smem>>
    %32 = arith.mulf %30, %0 : vector<2x256xf32>
    %cst_11 = arith.constant dense<0.000000e+00> : vector<2xf32>
    %33 = vector.multi_reduction <add>, %32, %cst_11 [1] : vector<2x256xf32> to vector<2xf32>
    %34 = vector.shape_cast %33 : vector<2xf32> to vector<2x1xf32>
    %35 = vector.broadcast %31 : f32 to vector<2x1xf32>
    %36 = arith.mulf %35, %34 : vector<2x1xf32>
    %37 = arith.addf %29, %36 : vector<2x1xf32>
    %cst_12 = arith.constant 3.906250e-03 : f32
    %38 = vector.broadcast %cst_12 : f32 to vector<2x1xf32>
    %39 = arith.mulf %37, %38 : vector<2x1xf32>
    %c0_13 = arith.constant 0 : index
    %c0_14 = arith.constant 0 : index
    %40 = vector.load %arg5[%c0_13, %c0_14] : memref<1x128xf32, #tpu.memory_space<vmem>>, vector<1x128xf32>
    %41 = vector.broadcast %39 : vector<2x1xf32> to vector<2x128xf32>
    %42 = vector.broadcast %40 : vector<1x128xf32> to vector<2x128xf32>
    %43 = arith.mulf %41, %42 : vector<2x128xf32>
    %c0_15 = arith.constant 0 : index
    %c0_16 = arith.constant 0 : index
    %44 = vector.load %arg6[%c0_15, %c0_16] : memref<1x128xf32, #tpu.memory_space<vmem>>, vector<1x128xf32>
    %45 = vector.broadcast %44 : vector<1x128xf32> to vector<2x128xf32>
    %46 = arith.addf %43, %45 : vector<2x128xf32>
    %c0_17 = arith.constant 0 : index
    %c0_18 = arith.constant 0 : index
    %47 = vector.load %arg7[%c0_17, %c0_18] : memref<2x128xf32, #tpu.memory_space<vmem>>, vector<2x128xf32>
    tpu.vector_store %arg7[%c0_17, %c0_18], %46 {strides = array<i32>} : memref<2x128xf32, #tpu.memory_space<vmem>>, vector<2x128xf32>,
    return
  }
  func.func @transform_0(%arg0: i32) -> (i32, i32) {
    %c0_i32 = arith.constant 0 : i32
    %c0_i32_0 = arith.constant 0 : i32
    return %arg0, %c0_i32 : i32, i32
  }
  func.func @transform_1(%arg0: i32) -> (i32, i32) {
    %c0_i32 = arith.constant 0 : i32
    %c0_i32_0 = arith.constant 0 : i32
    return %arg0, %c0_i32 : i32, i32
  }
  func.func @transform_2(%arg0: i32) -> i32 {
    %c0_i32 = arith.constant 0 : i32
    %c0_i32_0 = arith.constant 0 : i32
    return %c0_i32 : i32
  }
  func.func @transform_3(%arg0: i32) -> i32 {
    %c0_i32 = arith.constant 0 : i32
    %c0_i32_0 = arith.constant 0 : i32
    return %c0_i32 : i32
  }
  func.func @transform_4(%arg0: i32) -> (i32, i32) {
    %c0_i32 = arith.constant 0 : i32
    %c0_i32_0 = arith.constant 0 : i32
    %c0_i32_1 = arith.constant 0 : i32
    return %c0_i32, %c0_i32_0 : i32, i32
  }
  func.func @transform_5(%arg0: i32) -> (i32, i32) {
    %c0_i32 = arith.constant 0 : i32
    %c0_i32_0 = arith.constant 0 : i32
    %c0_i32_1 = arith.constant 0 : i32
    return %c0_i32, %c0_i32_0 : i32, i32
  }
  func.func @transform_6(%arg0: i32) -> (i32, i32) {
    %c0_i32 = arith.constant 0 : i32
    %c0_i32_0 = arith.constant 0 : i32
    return %arg0, %c0_i32 : i32, i32
  }
}

</mosaic_0001>

<bundles_post_ra>
// kernel: tpu_custom_call.1
= control target key start
LH: loop header
LB: loop body
LE: loop exit
PB: predicated region body
PF: predicated region fallthrough
CT: control target
= control target key end

     0   :  { %12 = vsyncpa [#allocation4], 0  ;;  %s352_s0 = inlined_call_operand.hbm [shape: f32[2,1024], index: 0, kind: input, shape index: {}]   ;;  %s353_s1 = inlined_call_operand.vmem [shape: f32[2,256], index: 1, kind: input, shape index: {}]   ;;  %s354_s2 = inlined_call_operand.vmem [shape: f32[4], index: 2, kind: input, shape index: {}]   ;;  %s355_s3 = inlined_call_operand.<no memory space> [shape: f32[1], index: 3, kind: input, shape index: {}]   ;;  %s356_s4 = inlined_call_operand.vmem [shape: f32[1,128], index: 4, kind: input, shape index: {}]   ;;  %s357_s5 = inlined_call_operand.vmem [shape: f32[1,128], index: 5, kind: input, shape index: {}]   ;;  %s358_s6 = inlined_call_operand.hbm [shape: f32[2,128], index: 6, kind: output, shape index: {}]  }
   0x1   :  { %13 = vsyncpa [#allocation6], 0 }
   0x2   :  { %14 = vsyncpa [#allocation5], 0  ;;  %s33_s23 = sshll.u32 %s354_s2, 4  ;;  %s264_s24 = smov [#allocation3]   ;;  %s34_s23 = int_to_ptr.vmem [resolvable:$true] %s33_s23 }
   0x3   :  { %s21_s25 = sshll.u32 %s264_s24, 4  ;;  %s202_s28 = scalar_lea.hbm %s352_s0, 256  ;;  %s22_s25 = int_to_ptr.vmem [resolvable:$true] %s21_s25 }
   0x4   :  { %p203_p0 = scmp.ne.s32.totalorder %s352_s0, %s202_s28  ;;  %p206_p1 = scmp.lt.u32.totalorder %s202_s28, %s352_s0 }
   0x6   :  { %p208_p2 = pnand %p206_p1, %p203_p0 }
   0x8   :  { %211 = shalt.err (!%p208_p2)
}
   0x9   :  { %s212_s9 = scalar_lea.vmem %s22_s25, 256  ;;  %p217_p4 = scmp.lt.s32.totalorder %s22_s25, %s22_s25 }
   0xa   :  { %p213_p3 = scmp.ne.s32.totalorder %s22_s25, %s212_s9  ;;  %p218_p5 = scmp.lt.s32.totalorder %s212_s9, %s212_s9 }
   0xc   :  { %p219_p6 = por %p218_p5, %p217_p4 }
   0xe   :  { %p220_p7 = pnand %p219_p6, %p213_p3 }
  0x10   :  { %223 = shalt.err (!%p220_p7)
}
  0x11   :  { %24 = dma.hbm_to_vmem [thread:$0]  %s352_s0, 256, %s22_s25, [#allocation4]  }
  0x12   :  { %s224_s11 = scalar_lea.vmem %s34_s23, 16  ;;  %p229_p9 = scmp.lt.s32.totalorder %s34_s23, %s34_s23 }
  0x13   :  { %p225_p8 = scmp.ne.s32.totalorder %s34_s23, %s224_s11  ;;  %p230_p10 = scmp.lt.s32.totalorder %s224_s11, %s224_s11 }
  0x15   :  { %p231_p11 = por %p230_p10, %p229_p9 }
  0x17   :  { %p232_p12 = pnand %p231_p11, %p225_p8 }
  0x19   :  { %235 = shalt.err (!%p232_p12)
}
  0x1a   :  { %s265_s12 = smov [#allocation7]  }
  0x1b   :  { %36 = dma.vmem_to_smem %s34_s23, 16, %s265_s12, [#allocation6]  }
  0x1c   :  { %258 = dma.done.wait [#allocation4], 256  }
  0x1d   :  { %259 = vsyncadd [#allocation4], 4294967040 }
  0x1e   :  { %260 = dma.done.wait [#allocation6], 16  }
  0x1f   :  { %261 = vsyncadd [#allocation6], 4294967280 }
  0x20   :  { %49 = sfence }
  0x21   :  { %v56_v0 = vlaneseq  ;;  %v266_v1 = vmov 1983009808   ;;  %v93_v3 = vld [vmem:[#allocation3 + $0x4] sm:$0xf]  ;;  %v71_v4 = vld [vmem:[#allocation3] sm:$0xf]  ;;  %v69_v42 = vstv %s355_s3 }
  0x22   :  { %v54_v2 = vunpack.c.l.s4 %v266_v1  ;;  %v115_v5 = vld [vmem:[#allocation3 + $0x8] sm:$0xf]  ;;  %v50_v6 = vld [vmem:[%s353_s1] sm:$0xf]  ;;  %v137_v8 = vld [vmem:[#allocation3 + $0xc] sm:$0xf] }
  0x23   :  { %v57_v7 = vshrl.u32 %v56_v0, 7  ;;  %v95_v10 = vmul.f32 %v93_v3, %v50_v6  ;;  %v73_v11 = vmul.f32 %v71_v4, %v50_v6  ;;  %v117_v12 = vmul.f32 %v115_v5, %v50_v6  ;;  %s72_s1 = sld [smem:[#allocation7]]  ;;  %s193_s14 = sld [smem:[#allocation7 + $0x1]]  ;;  %v196_v59 = vld [vmem:[%s356_s4] ss:$0 sm:$0xff] }
  0x24   :  { %v55_v9 = vunpack.c.0.s8 %v54_v2  ;;  %v139_v13 = vmul.f32 %v137_v8, %v50_v6  ;;  %vm63_vm0 = vcmask 1041408   ;;  %s194_s15 = sld [smem:[#allocation7 + $0x2]]  ;;  %s195_s16 = sld [smem:[#allocation7 + $0x3]]  ;;  %v197_v61 = vld [vmem:[%s357_s5] ss:$0 sm:$0xff] }
  0x25   :  { %s267_s22 = smov [#allocation8]  }
  0x26   :  { %v58_v14 = vsub.s32 %v55_v9, %v57_v7  ;;  %s183_s23 = sshll.u32 %s267_s22, 4  ;;  %s184_s23 = int_to_ptr.vmem [resolvable:$true] %s183_s23 }
  0x27   :  { %s236_s24 = scalar_lea.vmem %s184_s23, 32  ;;  %p241_p0 = scmp.lt.s32.totalorder %s184_s23, %s184_s23 }
  0x28   :  { %v59_v15 = vrot.slane %v50_v6, %v58_v14  ;;  %v103_v16 = vrot.slane %v95_v10, %v58_v14  ;;  %v81_v17 = vrot.slane %v73_v11, %v58_v14  ;;  %v125_v18 = vrot.slane %v117_v12, %v58_v14  ;;  %p237_p13 = scmp.ne.s32.totalorder %s184_s23, %s236_s24  ;;  %p242_p1 = scmp.lt.s32.totalorder %s236_s24, %s236_s24 }
  0x29   :  { %v147_v19 = vrot.slane %v139_v13, %v58_v14  ;;  %v90_v43 = vstv %s72_s1  ;;  %v112_v44 = vstv %s193_s14 }
  0x2a   :  { %v60_v20 = vcombine.high %v59_v15, %v59_v15  ;;  %v64_v21 = vsel %vm63_vm0, %v59_v15, 0.0  ;;  %v104_v22 = vcombine.high %v103_v16, %v103_v16  ;;  %v107_v23 = vsel %vm63_vm0, %v103_v16, 0.0  ;;  %p243_p2 = por %p242_p1, %p241_p0 }
  0x2b   :  { %v82_v24 = vcombine.high %v81_v17, %v81_v17  ;;  %v85_v25 = vsel %vm63_vm0, %v81_v17, 0.0  ;;  %v126_v26 = vcombine.high %v125_v18, %v125_v18  ;;  %v129_v29 = vsel %vm63_vm0, %v125_v18, 0.0 }
  0x2c   :  { %v65_v27 = vsel %vm63_vm0, %v60_v20, 0.0  ;;  %v108_v28 = vsel %vm63_vm0, %v104_v22, 0.0  ;;  %v148_v30 = vcombine.high %v147_v19, %v147_v19  ;;  %v151_v37 = vsel %vm63_vm0, %v147_v19, 0.0  ;;  %p244_p3 = pnand %p243_p2, %p237_p13 }
  0x2d   :  { %v66_v31 = vadd.f32 %v65_v27, %v64_v21  ;;  %v109_v32 = vadd.f32 %v108_v28, %v107_v23  ;;  %v86_v33 = vsel %vm63_vm0, %v82_v24, 0.0  ;;  %v130_v34 = vsel %vm63_vm0, %v126_v26, 0.0 }
  0x2e   :  { %v87_v35 = vadd.f32 %v86_v33, %v85_v25  ;;  %v131_v36 = vadd.f32 %v130_v34, %v129_v29  ;;  %v152_v38 = vsel %vm63_vm0, %v148_v30, 0.0  ;;  %v134_v46 = vstv %s194_s15 }
  0x2f   :  { %67 = vadd.xlane.f32.xlu0 %v66_v31  ;;  %110 = vadd.xlane.f32.xlu1 %v109_v32  ;;  %v153_v39 = vadd.f32 %v152_v38, %v151_v37  ;;  %v156_v50 = vstv %s195_s16 }
  0x33   :  { %88 = vadd.xlane.f32.xlu0 %v87_v35  ;;  %132 = vadd.xlane.f32.xlu1 %v131_v36 }
  0x37   :  { %154 = vadd.xlane.f32.xlu0 %v153_v39 }
  0xbc   :  { %v68_v40 = vpop.xlane.xlu0 %67  ;;  %v111_v41 = vpop.xlane.xlu1 %110 }
  0xbd   :  { %v70_v48 = vmul.f32 %v69_v42, %v68_v40  ;;  %v113_v51 = vmul.f32 %v112_v44, %v111_v41 }
  0xc0   :  { %v89_v45 = vpop.xlane.xlu0 %88  ;;  %v133_v47 = vpop.xlane.xlu1 %132 }
  0xc1   :  { %v91_v49 = vmul.f32 %v90_v43, %v89_v45  ;;  %v135_v53 = vmul.f32 %v134_v46, %v133_v47 }
  0xc3   :  { %v92_v52 = vadd.f32 %v91_v49, %v70_v48 }
  0xc4   :  { %v155_v54 = vpop.xlane.xlu0 %154 }
  0xc5   :  { %v114_v55 = vadd.f32 %v113_v51, %v92_v52  ;;  %v157_v56 = vmul.f32 %v156_v50, %v155_v54 }
  0xc7   :  { %v136_v57 = vadd.f32 %v135_v53, %v114_v55 }
  0xc9   :  { %v158_v58 = vadd.f32 %v157_v56, %v136_v57 }
  0xcb   :  { %v159_v60 = vmul.f32 0.00390625, %v158_v58 }
  0xcd   :  { %v167_v62 = vmul.f32 %v196_v59, %v159_v60 }
  0xcf   :  { %v175_v63 = vadd.f32 %v197_v61, %v167_v62 }
  0xd1   :  { %176 = vst [vmem:[#allocation8] sm:$0x3] %v175_v63 }
  0xd2   :  { %247 = shalt.err (!%p244_p3)
}
  0xd3   :  { %s248_s26 = scalar_lea.hbm %s358_s6, 32 }
  0xd4   :  { %p249_p4 = scmp.ne.s32.totalorder %s358_s6, %s248_s26  ;;  %p252_p5 = scmp.lt.u32.totalorder %s248_s26, %s358_s6 }
  0xd6   :  { %p254_p6 = pnand %p252_p5, %p249_p4 }
  0xd8   :  { %257 = shalt.err (!%p254_p6)
}
  0xd9   :  { %186 = dma.vmem_to_hbm [thread:$0]  %s184_s23, 32, %s358_s6, [#allocation5]  }
  0xda   :  { %262 = dma.done.wait [#allocation5], 32  }
  0xdb   :  { %263 = vsyncadd [#allocation5], 4294967264 }
  0xdc   :  { %190 = vsyncpa [#allocation4], 1 }
  0xdd   :  { %191 = vsyncpa [#allocation5], 1 }
  0xde   :  { %192 = vsyncpa [#allocation6], 1 }

</bundles_post_ra>
